<compile_context>
chip_gen: v6e
topology: v6e:2x2x1
jax: 0.10.0
libtpu: 0.0.40
codegen_flags: <defaults>
</compile_context>

<pallas_src>
import jax
import jax.numpy as jnp
from jax.experimental import pallas as pl
from jax.experimental.pallas import tpu as pltpu

IN_FEATURES = 3
OUT_FEATURES = 8
NEG_SLOPE = 0.2
LANE = 128
# Batch tile on the lane axis (multiple of 128). 64K lanes/step amortizes the
# fixed per-step cost on v5e/v6e/v7x while double-buffered VMEM stays small.
BLOCK_B = 65536
_VMEM_LIMIT = 48 * 1024 * 1024  # < physical VMEM on v5e/v6e (128 MiB) and v7x (64 MiB)


def _linear_leakyrelu_kernel(x_ref, w_ref, b_ref, o_ref):
    # x_ref: (IN, blk)   -- batch on the lane axis (lane-dense loads)
    # w_ref: (OUT, IN)   -- PyTorch weight layout (8, 3)
    # b_ref: (OUT, 1)
    # o_ref: (OUT, blk)  -- lane-dense stores
    x = x_ref[...]
    w = w_ref[...]
    # 3 VPU broadcast-FMAs instead of a <1%-utilized MXU pass; bias folded into
    # the first FMA.
    v = w[:, 0:1] * x[0:1, :] + b_ref[...]
    v = v + w[:, 1:2] * x[1:2, :]
    v = v + w[:, 2:3] * x[2:3, :]
    # LeakyReLU(0.2): max + slope*min (cheaper than cmp+select).
    o_ref[...] = (jnp.maximum(v, 0.0) + NEG_SLOPE * jnp.minimum(v, 0.0)).astype(o_ref.dtype)


def linear_leakyrelu_fmajor(x_t, weight, bias, *, block_b=BLOCK_B, out_dtype=None):
    """Core kernel in (features, batch) layout: x_t (3, B) -> (8, B).

    No entry/exit transposes; prefer this entry point when the surrounding
    graph can keep activations feature-major.
    """
    in_f, B = x_t.shape
    assert in_f == IN_FEATURES
    out_dtype = x_t.dtype if out_dtype is None else out_dtype
    w = weight.astype(jnp.float32)
    b_col = bias.reshape(OUT_FEATURES, 1).astype(jnp.float32)

    if B <= block_b:
        # Single block, no grid (no per-step pipeline scaffolding). Pad lanes
        # only to a multiple of 128 so stores stay unmasked; padded columns are
        # sliced off below.
        b_pad = pl.cdiv(B, LANE) * LANE
        x_p = jnp.pad(x_t, ((0, 0), (0, b_pad - B))) if b_pad != B else x_t
        out_t = pl.pallas_call(
            _linear_leakyrelu_kernel,
            out_shape=jax.ShapeDtypeStruct((OUT_FEATURES, b_pad), out_dtype),
            in_specs=[
                pl.BlockSpec(memory_space=pltpu.MemorySpace.VMEM),
                pl.BlockSpec(memory_space=pltpu.MemorySpace.VMEM),
                pl.BlockSpec(memory_space=pltpu.MemorySpace.VMEM),
            ],
            out_specs=pl.BlockSpec(memory_space=pltpu.MemorySpace.VMEM),
        )(x_p, w, b_col)
        return out_t[:, :B] if b_pad != B else out_t

    # Gridded only over the batch (lane) axis. No jnp.pad: grid = cdiv(B, blk)
    # and Pallas masks the ragged last block's stores. W / bias index_maps are
    # constant, so they stay VMEM-resident across grid steps.
    return pl.pallas_call(
        _linear_leakyrelu_kernel,
        out_shape=jax.ShapeDtypeStruct((OUT_FEATURES, B), out_dtype),
        grid=(pl.cdiv(B, block_b),),
        in_specs=[
            pl.BlockSpec((IN_FEATURES, block_b), lambda i: (0, i)),
            pl.BlockSpec((OUT_FEATURES, IN_FEATURES), lambda i: (0, 0)),
            pl.BlockSpec((OUT_FEATURES, 1), lambda i: (0, 0)),
        ],
        out_specs=pl.BlockSpec((OUT_FEATURES, block_b), lambda i: (0, i)),
        compiler_params=pltpu.CompilerParams(
            dimension_semantics=("parallel",),   # megacore sharding on v7x
            vmem_limit_bytes=_VMEM_LIMIT,
        ),
    )(x_t, w, b_col)


def linear_leakyrelu(x, weight, bias, *, block_b=BLOCK_B, out_dtype=None):
    """PyTorch-layout wrapper: x (B, 3) -> (B, 8).

    The entry/exit transposes here are extra XLA HBM passes kept only for the
    (B, features) contract; callers that can stay feature-major should use
    linear_leakyrelu_fmajor directly.
    """
    x_t = x.astype(jnp.float32).T                      # (IN, B)
    out_t = linear_leakyrelu_fmajor(x_t, weight, bias, block_b=block_b, out_dtype=out_dtype)
    return out_t.T                                     # (B, OUT)


def reference(x, weight, bias):
    v1 = x @ weight.T + bias
    return jnp.where(v1 > 0, v1, v1 * NEG_SLOPE)


if __name__ == "__main__":
    key = jax.random.PRNGKey(0)
    kx, kw, kb, kx2 = jax.random.split(key, 4)

    # Deterministic Linear(3, 8) parameters in PyTorch layout: weight (out, in), bias (out,).
    bound = 1.0 / (IN_FEATURES ** 0.5)
    weight = jax.random.uniform(kw, (OUT_FEATURES, IN_FEATURES), jnp.float32, -bound, bound)
    bias = jax.random.uniform(kb, (OUT_FEATURES,), jnp.float32, -bound, bound)

    # Small batch -> single-block (no-grid) path.
    B = 8
    x = jax.random.normal(kx, (B, IN_FEATURES), dtype=jnp.float32)
    out = linear_leakyrelu(x, weight, bias)
    jax.block_until_ready(out)
    ref = reference(x, weight, bias)
    assert out.shape == (B, OUT_FEATURES)
    assert jnp.allclose(out, ref, atol=1e-5, rtol=1e-5), "mismatch vs reference (small B)"

    # Non-aligned batch with a small block_b to exercise the gridded,
    # ragged-last-block path while keeping shapes small.
    B2 = 2 * 256 + 37
    x2 = jax.random.normal(kx2, (B2, IN_FEATURES), dtype=jnp.float32)
    out2 = linear_leakyrelu(x2, weight, bias, block_b=256)
    jax.block_until_ready(out2)
    ref2 = reference(x2, weight, bias)
    assert out2.shape == (B2, OUT_FEATURES)
    assert jnp.allclose(out2, ref2, atol=1e-5, rtol=1e-5), "mismatch vs reference (gridded B)"

    print("KERNEL_OK")
</pallas_src>

<mosaic_0001>
module attributes {stable_mosaic.version = 11 : i64} {
  func.func @_linear_leakyrelu_kernel(%arg0: memref<3x128xf32, #tpu.memory_space<vmem>>, %arg1: memref<8x3xf32, #tpu.memory_space<vmem>>, %arg2: memref<8x1xf32, #tpu.memory_space<vmem>>, %arg3: memref<8x128xf32, #tpu.memory_space<vmem>>) attributes {dimension_semantics = [], scalar_prefetch = 0 : i64, scratch_operands = 0 : i64, tpu.core_type = #tpu.core_type<tc>} {
    %c0 = arith.constant 0 : index
    %c0_0 = arith.constant 0 : index
    %0 = vector.load %arg0[%c0, %c0_0] : memref<3x128xf32, #tpu.memory_space<vmem>>, vector<3x128xf32>
    %c0_1 = arith.constant 0 : index
    %c0_2 = arith.constant 0 : index
    %1 = vector.load %arg1[%c0_1, %c0_2] : memref<8x3xf32, #tpu.memory_space<vmem>>, vector<8x3xf32>
    %2 = vector.extract_strided_slice %1 {offsets = [0, 0], sizes = [8, 1], strides = [1, 1]} : vector<8x3xf32> to vector<8x1xf32>
    %3 = vector.extract_strided_slice %0 {offsets = [0, 0], sizes = [1, 128], strides = [1, 1]} : vector<3x128xf32> to vector<1x128xf32>
    %4 = vector.broadcast %2 : vector<8x1xf32> to vector<8x128xf32>
    %5 = vector.broadcast %3 : vector<1x128xf32> to vector<8x128xf32>
    %6 = arith.mulf %4, %5 : vector<8x128xf32>
    %c0_3 = arith.constant 0 : index
    %c0_4 = arith.constant 0 : index
    %7 = vector.load %arg2[%c0_3, %c0_4] : memref<8x1xf32, #tpu.memory_space<vmem>>, vector<8x1xf32>
    %8 = vector.broadcast %7 : vector<8x1xf32> to vector<8x128xf32>
    %9 = arith.addf %6, %8 : vector<8x128xf32>
    %10 = vector.extract_strided_slice %1 {offsets = [0, 1], sizes = [8, 1], strides = [1, 1]} : vector<8x3xf32> to vector<8x1xf32>
    %11 = vector.extract_strided_slice %0 {offsets = [1, 0], sizes = [1, 128], strides = [1, 1]} : vector<3x128xf32> to vector<1x128xf32>
    %12 = vector.broadcast %10 : vector<8x1xf32> to vector<8x128xf32>
    %13 = vector.broadcast %11 : vector<1x128xf32> to vector<8x128xf32>
    %14 = arith.mulf %12, %13 : vector<8x128xf32>
    %15 = arith.addf %9, %14 : vector<8x128xf32>
    %16 = vector.extract_strided_slice %1 {offsets = [0, 2], sizes = [8, 1], strides = [1, 1]} : vector<8x3xf32> to vector<8x1xf32>
    %17 = vector.extract_strided_slice %0 {offsets = [2, 0], sizes = [1, 128], strides = [1, 1]} : vector<3x128xf32> to vector<1x128xf32>
    %18 = vector.broadcast %16 : vector<8x1xf32> to vector<8x128xf32>
    %19 = vector.broadcast %17 : vector<1x128xf32> to vector<8x128xf32>
    %20 = arith.mulf %18, %19 : vector<8x128xf32>
    %21 = arith.addf %15, %20 : vector<8x128xf32>
    %cst = arith.constant 0.000000e+00 : f32
    %22 = vector.broadcast %cst : f32 to vector<8x128xf32>
    %23 = arith.maximumf %21, %22 : vector<8x128xf32>
    %cst_5 = arith.constant 0.000000e+00 : f32
    %24 = vector.broadcast %cst_5 : f32 to vector<8x128xf32>
    %25 = arith.minimumf %21, %24 : vector<8x128xf32>
    %cst_6 = arith.constant 2.000000e-01 : f32
    %26 = vector.broadcast %cst_6 : f32 to vector<8x128xf32>
    %27 = arith.mulf %26, %25 : vector<8x128xf32>
    %28 = arith.addf %23, %27 : vector<8x128xf32>
    %c0_7 = arith.constant 0 : index
    %c0_8 = arith.constant 0 : index
    %29 = vector.load %arg3[%c0_7, %c0_8] : memref<8x128xf32, #tpu.memory_space<vmem>>, vector<8x128xf32>
    tpu.vector_store %arg3[%c0_7, %c0_8], %28 {strides = array<i32>} : memref<8x128xf32, #tpu.memory_space<vmem>>, vector<8x128xf32>,
    return
  }
}

</mosaic_0001>

<bundles_post_ra>
// kernel: tpu_custom_call.1
= control target key start
LH: loop header
LB: loop body
LE: loop exit
PB: predicated region body
PF: predicated region fallthrough
CT: control target
= control target key end

     0   :  { %v103_v1 = vmov 0   ;;  %v104_v2 = vmov 1   ;;  %s139_s0 = inlined_call_operand.vmem [shape: f32[3,128], index: 0, kind: input, shape index: {}]   ;;  %s140_s1 = inlined_call_operand.vmem [shape: f32[8,3], index: 1, kind: input, shape index: {}]   ;;  %s141_s2 = inlined_call_operand.vmem [shape: f32[8,1], index: 2, kind: input, shape index: {}]   ;;  %s142_s3 = inlined_call_operand.hbm [shape: f32[8,128], index: 3, kind: output, shape index: {}]  }
   0x1   :  { %v16_v0 = vld [vmem:[%s140_s1] sm:$0xff]  ;;  %77 = vset.pattern.permute.xlu0 %v103_v1  ;;  %78 = vset.pattern.permute.xlu1 %v104_v2 }
   0x2   :  { %8 = vsyncpa [#allocation3], 0  ;;  %19 = vperm.xlu0 %77, %v16_v0   ;;  %35 = vperm.xlu1 %78, %v16_v0   ;;  %v27_v3 = vld [vmem:[%s141_s2] sm:$0xff]  ;;  %v105_v4 = vmov 2   ;;  %v22_v5 = vlaneseq  ;;  %s106_s2 = smov [#allocation2]  }
   0x3   :  { %v15_v8 = vld [vmem:[%s139_s0] sm:$0x7]  ;;  %s65_s17 = sshll.u32 %s106_s2, 4  ;;  %s66_s17 = int_to_ptr.vmem [resolvable:$true] %s65_s17 }
   0x4   :  { %v23_v6 = vshrl.u32 %v22_v5, 7  ;;  %s81_s0 = scalar_lea.vmem %s66_s17, 128  ;;  %p86_p1 = scmp.lt.s32.totalorder %s66_s17, %s66_s17 }
   0x5   :  { %p82_p0 = scmp.ne.s32.totalorder %s66_s17, %s81_s0  ;;  %p87_p2 = scmp.lt.s32.totalorder %s81_s0, %s81_s0 }
   0x6   :  { %30 = vperm.xlu0 %77, %v27_v3   ;;  %79 = vset.pattern.permute.xlu1 %v105_v4  ;;  %v24_v7 = vsub.s32 0, %v23_v6  ;;  %v40_v9 = vsub.s32 1, %v23_v6  ;;  %v50_v10 = vsub.s32 2, %v23_v6 }
   0x7   :  { %45 = vperm.xlu1 %79, %v16_v0   ;;  %p88_p3 = por %p87_p2, %p86_p1 }
   0x8   :  { %v25_v11 = vrot.slane %v15_v8, %v24_v7  ;;  %v41_v14 = vrot.slane %v15_v8, %v40_v9  ;;  %v51_v15 = vrot.slane %v15_v8, %v50_v10 }
   0x9   :  { %p89_p4 = pnand %p88_p3, %p82_p0 }
   0xa   :  { %80 = vset.pattern.permute.xlu0 %v105_v4 }
  0x7d   :  { %v20_v12 = vpop.permute.xlu0 %19  ;;  %v36_v13 = vpop.permute.xlu1 %35 }
  0x7e   :  { %v26_v16 = vmul.f32 %v25_v11, %v20_v12  ;;  %v42_v18 = vmul.f32 %v41_v14, %v36_v13 }
  0x81   :  { %v31_v17 = vpop.permute.xlu0 %30 }
  0x82   :  { %v33_v19 = vadd.f32 %v31_v17, %v26_v16  ;;  %v46_v20 = vpop.permute.xlu1 %45 }
  0x83   :  { %v52_v21 = vmul.f32 %v51_v15, %v46_v20 }
  0x84   :  { %v43_v22 = vadd.f32 %v42_v18, %v33_v19 }
  0x86   :  { %v53_v23 = vadd.f32 %v52_v21, %v43_v22 }
  0x88   :  { %v55_v24 = vmin.f32 %v53_v23, 0.0  ;;  %v54_v25 = vmax.f32 %v53_v23, 0.0 }
  0x8a   :  { %v56_v26 = vmul.f32 0.2, %v55_v24 }
  0x8c   :  { %v57_v27 = vadd.f32 %v56_v26, %v54_v25 }
  0x8e   :  { %58 = vst [vmem:[#allocation2] sm:$0xff] %v57_v27 }
  0x8f   :  { %92 = shalt.err (!%p89_p4)
}
  0x90   :  { %68 = dma.vmem_to_hbm [thread:$0]  %s66_s17, 128, %s142_s3, [#allocation3]  }
  0x91   :  { %101 = dma.done.wait [#allocation3], 128  }
  0x92   :  { %102 = vsyncadd [#allocation3], 4294967168 }
  0x93   :  { %72 = vsyncpa [#allocation3], 1 }

</bundles_post_ra>
